<compile_context>
chip_gen: v5e
topology: v5e:2x2
jax: 0.10.0
libtpu: 0.0.40
codegen_flags: <defaults>
</compile_context>

<pallas_src>
import jax
import jax.numpy as jnp
from jax.experimental import pallas as pl
from jax.experimental.pallas import tpu as pltpu


def _interp_matrix(in_size: int, out_size: int) -> jnp.ndarray:
    """Row-stochastic (out_size, in_size) matrix implementing 1-D linear
    interpolation with align_corners=True (PyTorch semantics)."""
    if in_size == 1:
        return jnp.ones((out_size, 1), dtype=jnp.float32)
    if out_size == 1:
        # align_corners=True with a single output sample -> take the first pixel.
        return jnp.zeros((1, in_size), dtype=jnp.float32).at[0, 0].set(1.0)
    i = jnp.arange(out_size, dtype=jnp.float32)
    src = i * (in_size - 1) / (out_size - 1)
    p0 = jnp.clip(jnp.floor(src).astype(jnp.int32), 0, in_size - 1)
    p1 = jnp.clip(p0 + 1, 0, in_size - 1)
    frac = src - p0.astype(jnp.float32)
    rows = jnp.arange(out_size)
    A = jnp.zeros((out_size, in_size), dtype=jnp.float32)
    A = A.at[rows, p0].add(1.0 - frac)
    A = A.at[rows, p1].add(frac)
    return A


# --------------------------------------------------------------------------
# Kernel 1: fused spatial operator (small H*W): 2 matmuls, 0 transposes.
# --------------------------------------------------------------------------
def _upsample_conv_fused_kernel(x_ref, w_ref, b_ref, k_ref, o_ref):
    """x_ref: (1, Cin, H*W), w_ref: (Cout, Cin), b_ref: (Cout, 1) f32,
    k_ref: (H*W, H2*W2) = kron(A_h, A_w)^T, o_ref: (1, Cout, H2*W2)."""
    cdt = x_ref.dtype
    x = x_ref[0]                                                     # (Cin, H*W)

    # 1x1 conv at low resolution, bias folded in (exact: interp rows sum to 1).
    z = jnp.dot(w_ref[...], x, preferred_element_type=jnp.float32)   # (Cout, H*W)
    z = (z + b_ref[...]).astype(cdt)

    # Fused H+W interpolation: one lane-dense MXU matmul, no relayouts.
    out = jnp.dot(z, k_ref[...], preferred_element_type=jnp.float32)  # (Cout, H2*W2)
    o_ref[0] = out.astype(o_ref.dtype)


# --------------------------------------------------------------------------
# Kernel 2: separable path (large H*W): 3 matmuls, 2 XLU transposes.
# --------------------------------------------------------------------------
def _upsample_conv_separable_kernel(x_ref, w_ref, b_ref, ah_ref, awt_ref, o_ref):
    """x_ref: (1, Cin, H*W), w_ref: (Cout, Cin), b_ref: (Cout, 1) f32,
    ah_ref: (H2, H), awt_ref: (W, W2), o_ref: (1, Cout, H2*W2)."""
    cout = w_ref.shape[0]
    h2, h = ah_ref.shape
    w, w2 = awt_ref.shape
    cdt = x_ref.dtype

    x = x_ref[0]                                                     # (Cin, H*W)

    # 1) 1x1 conv at low resolution, bias folded in.
    z = jnp.dot(w_ref[...], x, preferred_element_type=jnp.float32)   # (Cout, H*W)
    z = (z + b_ref[...]).astype(cdt)

    # 2) width interpolation: (Cout*H, W) @ (W, W2).
    zw = jnp.dot(z.reshape(cout * h, w), awt_ref[...],
                 preferred_element_type=jnp.float32).astype(cdt)      # (Cout*H, W2)

    # 3) height interpolation: (H2, H) @ (H, Cout*W2) after one transpose
    #    (XLU slot, off the MXU/VPU critical path).
    zt = zw.reshape(cout, h, w2).transpose(1, 0, 2).reshape(h, cout * w2)
    u = jnp.dot(ah_ref[...], zt, preferred_element_type=jnp.float32)  # (H2, Cout*W2)

    # 4) back to channel-major, flattened spatial -> lane-dense store.
    out = u.reshape(h2, cout, w2).transpose(1, 0, 2).reshape(cout, h2 * w2)
    o_ref[0] = out.astype(o_ref.dtype)


def _vmem_limit_bytes(est_bytes: int):
    """Only raise the scoped VMEM limit when the default would be exceeded."""
    if est_bytes > 16 * 1024 * 1024:
        return int(min(48 * 1024 * 1024, 2 * est_bytes))
    return None


def upsampling_module_forward(x, weight, bias, scale_factor=2,
                              compute_dtype=jnp.float32,
                              max_fused_spatial_bytes=4 * 1024 * 1024):
    """Forward pass of UpsamplingModule (2-D path).

    x:      (N, Cin, H, W)
    weight: (Cout, Cin, 1, 1) or (Cout, Cin)   -- 1x1 Conv2d weight
    bias:   (Cout,)
    compute_dtype: jnp.float32 (default) or jnp.bfloat16 (use on v6e/v7x for
        2x MXU throughput / half the HBM bytes; accumulation stays f32).
    max_fused_spatial_bytes: budget for the precomputed kron(A_h, A_w)^T
        operator; below it the fused (transpose-free) path is used.
    """
    N, Cin, H, W = x.shape
    Cout = weight.shape[0]
    H2, W2 = int(H * scale_factor), int(W * scale_factor)

    ah_f32 = _interp_matrix(H, H2)                           # (H2, H)
    aw_f32 = _interp_matrix(W, W2)                           # (W2, W)
    wmat = weight.reshape(Cout, -1).astype(compute_dtype)    # (Cout, Cin)
    b2 = bias.reshape(Cout, 1).astype(jnp.float32)           # bias kept f32

    # Free HBM reshape: flatten spatial dims so in-kernel loads are lane-dense.
    x_flat = x.astype(compute_dtype).reshape(N, Cin, H * W)

    c_item = jnp.dtype(compute_dtype).itemsize
    o_item = x.dtype.itemsize
    kron_bytes = (H * W) * (H2 * W2) * c_item
    use_fused = kron_bytes <= max_fused_spatial_bytes

    common_params = dict(
        out_shape=jax.ShapeDtypeStruct((N, Cout, H2 * W2), x.dtype),
    )

    if use_fused:
        # kron(A_h, A_w)[h2*W2+w2, h*W+w] = A_h[h2,h] * A_w[w2,w]; we need its
        # transpose so the kernel right-multiplies the conv result by it.
        k_spatial = jnp.kron(ah_f32, aw_f32).T.astype(compute_dtype)  # (H*W, H2*W2)

        est_bytes = (
            2 * (Cin * H * W * c_item + Cout * H2 * W2 * o_item)       # pipelined I/O
            + (Cout * Cin + H * W * H2 * W2) * c_item + Cout * 4       # resident operands
            + 4 * (Cout * H * W + Cout * H2 * W2)                      # f32 intermediates
        )
        out_flat = pl.pallas_call(
            _upsample_conv_fused_kernel,
            grid_spec=pltpu.PrefetchScalarGridSpec(
                num_scalar_prefetch=0,
                grid=(N,),
                in_specs=[
                    pl.BlockSpec((1, Cin, H * W), lambda n: (n, 0, 0)),
                    pl.BlockSpec((Cout, Cin), lambda n: (0, 0)),
                    pl.BlockSpec((Cout, 1), lambda n: (0, 0)),
                    pl.BlockSpec((H * W, H2 * W2), lambda n: (0, 0)),
                ],
                out_specs=pl.BlockSpec((1, Cout, H2 * W2), lambda n: (n, 0, 0)),
            ),
            compiler_params=pltpu.CompilerParams(
                dimension_semantics=("parallel",),
                vmem_limit_bytes=_vmem_limit_bytes(est_bytes)),
            **common_params,
        )(x_flat, wmat, b2, k_spatial)
    else:
        ah = ah_f32.astype(compute_dtype)        # (H2, H)
        awt = aw_f32.T.astype(compute_dtype)     # (W, W2)

        est_bytes = (
            2 * (Cin * H * W * c_item + Cout * H2 * W2 * o_item)
            + (H2 * H + W * W2 + Cout * Cin) * c_item + Cout * 4
            + 4 * (Cout * H * W + 2 * Cout * H * W2 + Cout * H2 * W2)
        )
        # TODO(synk): for very large GANDLF images tile Cout / H2 rows instead
        # of whole-image blocks (mandatory on v7x, which has only 64 MiB VMEM).
        out_flat = pl.pallas_call(
            _upsample_conv_separable_kernel,
            grid_spec=pltpu.PrefetchScalarGridSpec(
                num_scalar_prefetch=0,
                grid=(N,),
                in_specs=[
                    pl.BlockSpec((1, Cin, H * W), lambda n: (n, 0, 0)),
                    pl.BlockSpec((Cout, Cin), lambda n: (0, 0)),
                    pl.BlockSpec((Cout, 1), lambda n: (0, 0)),
                    pl.BlockSpec((H2, H), lambda n: (0, 0)),
                    pl.BlockSpec((W, W2), lambda n: (0, 0)),
                ],
                out_specs=pl.BlockSpec((1, Cout, H2 * W2), lambda n: (n, 0, 0)),
            ),
            compiler_params=pltpu.CompilerParams(
                dimension_semantics=("parallel",),
                vmem_limit_bytes=_vmem_limit_bytes(est_bytes)),
            **common_params,
        )(x_flat, wmat, b2, ah, awt)

    # Free HBM reshape back to NCHW.
    return out_flat.reshape(N, Cout, H2, W2)


def _reference(x, weight, bias, scale_factor=2):
    """Pure-JAX reference in the ORIGINAL op order (interpolate, then conv)."""
    N, Cin, H, W = x.shape
    H2, W2 = int(H * scale_factor), int(W * scale_factor)
    ah = _interp_matrix(H, H2)
    aw = _interp_matrix(W, W2)
    up = jnp.einsum('hp,ncpq,wq->nchw', ah, x, aw)
    wmat = weight.reshape(weight.shape[0], -1)
    out = jnp.einsum('oc,nchw->nohw', wmat, up) + bias[None, :, None, None]
    return out


if __name__ == "__main__":
    key = jax.random.PRNGKey(0)
    kx, kw, kb = jax.random.split(key, 3)

    N, Cin, Cout, H, W = 2, 4, 4, 16, 16
    x = jax.random.normal(kx, (N, Cin, H, W), dtype=jnp.float32)
    # PyTorch Conv2d 1x1 weight layout: (Cout, Cin, 1, 1)
    weight = jax.random.normal(kw, (Cout, Cin, 1, 1), dtype=jnp.float32) * 0.1
    bias = jax.random.normal(kb, (Cout,), dtype=jnp.float32) * 0.1

    y_ref = _reference(x, weight, bias, scale_factor=2)

    # Fused (transpose-free, single spatial matmul) path.
    y_fused = jax.block_until_ready(
        upsampling_module_forward(x, weight, bias, scale_factor=2))
    assert y_fused.shape == (N, Cout, 2 * H, 2 * W), y_fused.shape
    assert jnp.allclose(y_fused, y_ref, atol=2e-4, rtol=2e-4), \
        float(jnp.max(jnp.abs(y_fused - y_ref)))

    # Separable (3-matmul) fallback path, forced by a zero fusion budget.
    y_sep = jax.block_until_ready(
        upsampling_module_forward(x, weight, bias, scale_factor=2,
                                  max_fused_spatial_bytes=0))
    assert y_sep.shape == (N, Cout, 2 * H, 2 * W), y_sep.shape
    assert jnp.allclose(y_sep, y_ref, atol=2e-4, rtol=2e-4), \
        float(jnp.max(jnp.abs(y_sep - y_ref)))

    print("KERNEL_OK")
</pallas_src>

<mosaic_0001>
module attributes {stable_mosaic.version = 11 : i64} {
  func.func @_upsample_conv_fused_kernel(%arg0: i32, %arg1: memref<1x4x256xf32, #tpu.memory_space<vmem>>, %arg2: memref<4x4xf32, #tpu.memory_space<vmem>>, %arg3: memref<4x1xf32, #tpu.memory_space<vmem>>, %arg4: memref<256x1024xf32, #tpu.memory_space<vmem>>, %arg5: memref<1x4x1024xf32, #tpu.memory_space<vmem>>) attributes {dimension_semantics = [#tpu.dimension_semantics<parallel>], iteration_bounds = array<i64: 2>, scalar_prefetch = 0 : i64, scratch_operands = 0 : i64, tpu.core_type = #tpu.core_type<tc>, window_params = [{transform_indices = @transform_0, window_bounds = array<i64: 1, 4, 256>}, {pipeline_mode = #tpu.pipeline_mode<synchronous>, transform_indices = @transform_1, window_bounds = array<i64: 4, 4>}, {pipeline_mode = #tpu.pipeline_mode<synchronous>, transform_indices = @transform_2, window_bounds = array<i64: 4, 1>}, {pipeline_mode = #tpu.pipeline_mode<synchronous>, transform_indices = @transform_3, window_bounds = array<i64: 256, 1024>}, {transform_indices = @transform_4, window_bounds = array<i64: 1, 4, 1024>}]} {
    %c0 = arith.constant 0 : index
    %c0_0 = arith.constant 0 : index
    %c0_1 = arith.constant 0 : index
    %0 = vector.load %arg1[%c0, %c0_0, %c0_1] : memref<1x4x256xf32, #tpu.memory_space<vmem>>, vector<1x4x256xf32>
    %1 = vector.shape_cast %0 : vector<1x4x256xf32> to vector<4x256xf32>
    %c0_2 = arith.constant 0 : index
    %c0_3 = arith.constant 0 : index
    %2 = vector.load %arg2[%c0_2, %c0_3] : memref<4x4xf32, #tpu.memory_space<vmem>>, vector<4x4xf32>
    %cst = arith.constant dense<0.000000e+00> : vector<4x256xf32>
    %3 = tpu.matmul %2, %1, %cst {dimension_numbers = #tpu.dot_dimension_numbers<[1], [0], [0], [1], [0, 0, 1, 1], [], []>} : vector<4x4xf32>, vector<4x256xf32>, vector<4x256xf32> -> vector<4x256xf32>
    %c0_4 = arith.constant 0 : index
    %c0_5 = arith.constant 0 : index
    %4 = vector.load %arg3[%c0_4, %c0_5] : memref<4x1xf32, #tpu.memory_space<vmem>>, vector<4x1xf32>
    %5 = vector.broadcast %4 : vector<4x1xf32> to vector<4x256xf32>
    %6 = arith.addf %3, %5 : vector<4x256xf32>
    %c0_6 = arith.constant 0 : index
    %c0_7 = arith.constant 0 : index
    %7 = vector.load %arg4[%c0_6, %c0_7] : memref<256x1024xf32, #tpu.memory_space<vmem>>, vector<256x1024xf32>
    %cst_8 = arith.constant dense<0.000000e+00> : vector<4x1024xf32>
    %8 = tpu.matmul %6, %7, %cst_8 {dimension_numbers = #tpu.dot_dimension_numbers<[1], [0], [0], [1], [0, 0, 1, 1], [], []>} : vector<4x256xf32>, vector<256x1024xf32>, vector<4x1024xf32> -> vector<4x1024xf32>
    %c0_9 = arith.constant 0 : index
    %c0_10 = arith.constant 0 : index
    %c0_11 = arith.constant 0 : index
    %9 = vector.load %arg5[%c0_9, %c0_10, %c0_11] : memref<1x4x1024xf32, #tpu.memory_space<vmem>>, vector<1x4x1024xf32>
    %10 = vector.shape_cast %9 : vector<1x4x1024xf32> to vector<4x1024xf32>
    %11 = vector.shape_cast %8 : vector<4x1024xf32> to vector<1x4x1024xf32>
    tpu.vector_store %arg5[%c0_9, %c0_10, %c0_11], %11 {strides = array<i32>} : memref<1x4x1024xf32, #tpu.memory_space<vmem>>, vector<1x4x1024xf32>,
    return
  }
  func.func @transform_0(%arg0: i32) -> (i32, i32, i32) {
    %c0_i32 = arith.constant 0 : i32
    %c0_i32_0 = arith.constant 0 : i32
    %c0_i32_1 = arith.constant 0 : i32
    return %arg0, %c0_i32, %c0_i32_0 : i32, i32, i32
  }
  func.func @transform_1(%arg0: i32) -> (i32, i32) {
    %c0_i32 = arith.constant 0 : i32
    %c0_i32_0 = arith.constant 0 : i32
    %c0_i32_1 = arith.constant 0 : i32
    return %c0_i32, %c0_i32_0 : i32, i32
  }
  func.func @transform_2(%arg0: i32) -> (i32, i32) {
    %c0_i32 = arith.constant 0 : i32
    %c0_i32_0 = arith.constant 0 : i32
    %c0_i32_1 = arith.constant 0 : i32
    return %c0_i32, %c0_i32_0 : i32, i32
  }
  func.func @transform_3(%arg0: i32) -> (i32, i32) {
    %c0_i32 = arith.constant 0 : i32
    %c0_i32_0 = arith.constant 0 : i32
    %c0_i32_1 = arith.constant 0 : i32
    return %c0_i32, %c0_i32_0 : i32, i32
  }
  func.func @transform_4(%arg0: i32) -> (i32, i32, i32) {
    %c0_i32 = arith.constant 0 : i32
    %c0_i32_0 = arith.constant 0 : i32
    %c0_i32_1 = arith.constant 0 : i32
    return %arg0, %c0_i32, %c0_i32_0 : i32, i32, i32
  }
}

</mosaic_0001>

<bundles_post_ra>
// kernel: tpu_custom_call.1
= control target key start
LH: loop header
LB: loop body
LE: loop exit
PB: predicated region body
PF: predicated region fallthrough
CT: control target
= control target key end

     0   :  { %9 = vsyncpa [#allocation3], 0  ;;  %s1411_s0 = inlined_call_operand.hbm [shape: f32[2,4,256], index: 0, kind: input, shape index: {}]   ;;  %s1412_s1 = inlined_call_operand.vmem [shape: f32[4,4], index: 1, kind: input, shape index: {}]   ;;  %s1413_s2 = inlined_call_operand.vmem [shape: f32[4,1], index: 2, kind: input, shape index: {}]   ;;  %s1414_s3 = inlined_call_operand.hbm [shape: f32[256,1024], index: 3, kind: input, shape index: {}]   ;;  %s1415_s4 = inlined_call_operand.hbm [shape: f32[2,4,1024], index: 4, kind: output, shape index: {}]  }
   0x1   :  { %11 = vsyncpa [#allocation3 + $0x1], 0 }
   0x2   :  { %12 = vsyncpa [#allocation6], 0 }
   0x3   :  { %13 = vsyncpa [#allocation4], 0 }
   0x4   :  { %15 = vsyncpa [#allocation4 + $0x1], 0  ;;  %s1235_s15 = smov 0   ;;  %s1237_s16 = smov 0  }
   0x5   :  { %s1239_s17 = smov 0   ;;  %s1241_s18 = smov 0  }
   0x6 LB: > { %s158_s21 = sshll.u32 %s1414_s3, 4  ;;  %s1259_s22 = sadd.s32 4294967295, %s1204_s18   ;;  %s1204_s18 = sphi %s1241_s18, %s1425_s18   ;;  %s1200_s17 = sphi %s1239_s17, %s1424_s17   ;;  %s1196_s16 = sphi %s1237_s16, %s1423_s16   ;;  %s1192_s15 = sphi %s1235_s15, %s1422_s15   ;;  %s159_s21 = int_to_ptr.hbm [resolvable:$true] %s158_s21 }
   0x7   : > { %p992_p0 = scmp.ge.s32.totalorder %s1204_s18, 1  ;;  %p42_p1 = scmp.eq.s32.totalorder %s1259_s22, 0 }
   0x8   : > { %p141_p2 = scmp.lt.s32.totalorder %s1204_s18, 3  ;;  %s1206_s24 = smov [#allocation5]  }
   0x9   : > { %s160_s25 = sshll.u32 %s1206_s24, 4  ;;  %s1207_s26 = smov 1024   ;;  %s161_s25 = int_to_ptr.vmem [resolvable:$true] %s160_s25 }
   0xa   : > { %p1264_p3 = pnand %p992_p0, %p141_p2  ;;  %s1208_s27 = smov 64  }
   0xb   : > { %s991_s28 = sadd.s32 4294967294, %s1204_s18   ;;  %s1275_s29 = sadd.s32 1, %s1204_s18  }
   0xc   : > { %p1021_p4 = pneg %p1264_p3  ;;  %s28_s30 = sadd.s32 1, %s1200_s17 }
   0xd   : > { %s25_s5 = ssub.s32 %s1204_s18, %s1275_s29  ;;  %p35_p7 = scmp.ne.s32.totalorder %s1200_s17, %s1196_s16 }
   0xe   : > { %p1022_p6 = pnand %p1021_p4, %p42_p1  ;;  %p26_p8 = scmp.eq.s32.totalorder %s25_s5, 0 }
   0xf   : > { %p36_p9 = scmp.eq.s32.totalorder %s1204_s18, 0  ;;  %p41_p10 = scmp.ne.s32.totalorder %s1196_s16, %s1192_s15 }
  0x10   : > { %1024 = dma.hbm_to_vmem [thread:$0]  (!%p1022_p6), %s159_s21, 32768, %s161_s25, [#allocation6], %s1207_s26, %s1207_s26, %s1208_s27  }
  0x11   : > { %p128_p11 = scmp.eq.s32.totalorder %s1259_s22, 1  ;;  %p1291_p12 = por %p42_p1, %p41_p10 }
  0x12   : > { %s1287_s6 = scalar_select %p26_p8, %s1200_s17, %s28_s30  }
  0x13   : > { %p1295_p13 = por %p128_p11, %p35_p7  ;;  %p134_p0 = scmp.eq.s32.totalorder %s991_s28, 1 }
  0x14   : > { %p37_p2 = por %p36_p9, %p35_p7  ;;  %s174_s9 = sand.u32 1, %s1200_s17  }
  0x15   : > { %p1300_p4 = por %p134_p0, %p41_p10  ;;  %p1034_p6 = scmp.lt.s32.totalorder %s1204_s18, 2 }
  0x16   : > { %s995_s11 = sshll.u32 %s174_s9, 3  ;;  %s1011_s12 = sshll.u32 %s1204_s18, 3 }
  0x17   : > { %s183_s19 = scalar_lea.hbm %s1411_s0, %s1011_s12  ;;  %s178_s21 = scalar_lea.vmem [#allocation2], %s995_s11 }
  0x18   : > { %s185_s20 = sshll.u32 %s183_s19, 4  ;;  %s187_s24 = sshll.u32 %s178_s21, 4  ;;  %s186_s20 = int_to_ptr.hbm [resolvable:$true] %s185_s20  ;;  %s188_s24 = int_to_ptr.vmem [resolvable:$true] %s187_s24 }
  0x19   : > { %p1309_p8 = pnand %p1034_p6, %p37_p2  ;;  %s175_s26 = scalar_lea.sflag [#allocation3], %s174_s9 }
  0x1a   : > { %s1104_s27 = sshra.s32 %s186_s20, 4  ;;  %s1111_s11 = scalar_lea.hbm %s1411_s0, 16  ;;  %s1105_s27 = int_to_ptr.hbm [resolvable:$true] %s1104_s27 }
  0x1b   : > { %s1106_s28 = scalar_lea.hbm %s1105_s27, 8  ;;  %p1108_p9 = pneg %p1309_p8 }
  0x1c   : > { %p1107_p7 = scmp.ne.s32.totalorder %s1105_s27, %s1106_s28  ;;  %p1112_p0 = scmp.lt.s32.totalorder %s1105_s27, %s1411_s0 }
  0x1d   : > { %p1113_p2 = scmp.lt.s32.totalorder %s1111_s11, %s1106_s28 }
  0x1e   : > { %p1109_p10 = pnand %p1108_p9, %p1107_p7 }
  0x1f   : > { %p1114_p6 = por %p1113_p2, %p1112_p0 }
  0x20   : > { %p1110_p11 = pneg %p1109_p10 }
  0x22   : > { %p1115_p5 = pnand %p1114_p6, %p1110_p11 }
  0x24   : > { %1118 = shalt.err (!%p1115_p5)
}
  0x25   : > { %1028 = dma.hbm_to_vmem [thread:$0]  (!%p1309_p8), %s186_s20, 128, %s188_s24, %s175_s26  }
  0x26   : > { %196 = sbr.rel (%p1264_p3) target bundleno = 392 (0x188), region = 36  ;;  %s1326_s9 = sand.u32 (!%p1264_p3), 1, %s1196_s16  }
  0x27   : > { %s999_s14 = sshll.u32 (!%p1264_p3), %s1326_s9, 3  ;;  %s199_s19 = scalar_lea.sflag (!%p1264_p3), [#allocation3], %s1326_s9 }
  0x28   : > { %s202_s21 = scalar_lea.vmem (!%p1264_p3), [#allocation2], %s999_s14 }
  0x2b   : > { %1179 = dma.done.wait (%p1291_p12), %s199_s19, 128  }
  0x2c   : > { %1181 = vsyncadd (%p1291_p12), %s199_s19, 4294967168 }
  0x2d   : > { %1183 = dma.done.wait (%p42_p1), [#allocation6], 32768  }
  0x2e   : > { %1185 = vsyncadd (%p42_p1), [#allocation6], 4294934528  ;;  %v1209_v0 = vmov 0   ;;  %v233_v1 = vld [vmem:[%s202_s21] sm:$0xff]  ;;  %v235_v2 = vld [vmem:[%s1413_s2] sm:$0xf] }
  0x2f   : > { %1073 = vset.pattern.permute.xlu0 %v1209_v0  ;;  %242 = vst [vmem:[#allocation1] ss:$2 sm:$0xff] %v233_v1  ;;  %v414_v3 = vld [vmem:[#allocation5 + $0x3c0] sm:$0xff]  ;;  %vm249_vm0 = vcmask 1043456   ;;  %v234_v11 = vld [vmem:[%s1412_s1] sm:$0xf] }
  0x30   : > { %238 = vperm.xlu0 %1073, %v235_v2   ;;  %v542_v4 = vld [vmem:[#allocation5 + $0x7c0] sm:$0xff]  ;;  %550 = vmatpush.msra.mxu2 %v414_v3  ;;  %vm245_vm1 = vcmask 31744   ;;  %v415_v12 = vld [vmem:[#allocation5 + $0x3c8] sm:$0xff]  ;;  %v416_v0 = vld [vmem:[#allocation5 + $0x3d0] sm:$0xff]  ;;  %s1001_s25 = sshll.u32 %s1326_s9, 5  ;;  %s1012_s27 = sshll.u32 %s1259_s22, 5 }
  0x31   : > { %570 = vmatpush.msra.mxu3 %v542_v4  ;;  %v406_v5 = vld [vmem:[#allocation5 + $0x380] sm:$0xff]  ;;  %v543_v13 = vld [vmem:[#allocation5 + $0x7c8] sm:$0xff]  ;;  %v544_v1 = vld [vmem:[#allocation5 + $0x7d0] sm:$0xff]  ;;  %s1368_s26 = scalar_lea.vmem [#allocation7], %s1001_s25  ;;  %s906_s5 = scalar_lea.hbm %s1415_s4, %s1012_s27 }
  0x32   : > { %v534_v6 = vld [vmem:[#allocation5 + $0x780] sm:$0xff]  ;;  %551 = vmatpush.msra.mxu2 %v406_v5  ;;  %v407_v18 = vld [vmem:[#allocation5 + $0x388] sm:$0xff]  ;;  %v408_v4 = vld [vmem:[#allocation5 + $0x390] sm:$0xff]  ;;  %s908_s11 = sshll.u32 %s1368_s26, 4  ;;  %s910_s12 = sshll.u32 %s906_s5, 4  ;;  %s909_s11 = int_to_ptr.vmem [resolvable:$true] %s908_s11  ;;  %s911_s12 = int_to_ptr.hbm [resolvable:$true] %s910_s12 }
  0x33   : > { %v398_v7 = vld [vmem:[#allocation5 + $0x340] sm:$0xff]  ;;  %571 = vmatpush.msra.mxu3 %v534_v6  ;;  %v535_v19 = vld [vmem:[#allocation5 + $0x788] sm:$0xff]  ;;  %v536_v5 = vld [vmem:[#allocation5 + $0x790] sm:$0xff]  ;;  %s895_s22 = scalar_lea.sflag [#allocation4], %s1326_s9  ;;  %s1148_s13 = sshra.s32 %s911_s12, 4  ;;  %s1149_s13 = int_to_ptr.hbm [resolvable:$true] %s1148_s13 }
  0x34   : > { %v526_v8 = vld [vmem:[#allocation5 + $0x740] sm:$0xff]  ;;  %552 = vmatpush.msra.mxu2 %v398_v7  ;;  %v399_v22 = vld [vmem:[#allocation5 + $0x348] sm:$0xff]  ;;  %s1150_s14 = scalar_lea.hbm %s1149_s13, 32  ;;  %s1154_s23 = scalar_lea.hbm %s1415_s4, 64 }
  0x35   : > { %v390_v9 = vld [vmem:[#allocation5 + $0x300] sm:$0xff]  ;;  %572 = vmatpush.msra.mxu3 %v526_v8  ;;  %v527_v23 = vld [vmem:[#allocation5 + $0x748] sm:$0xff]  ;;  %v400_v8 = vld [vmem:[#allocation5 + $0x350] sm:$0xff]  ;;  %p1151_p1 = scmp.ne.s32.totalorder %s1149_s13, %s1150_s14  ;;  %p1155_p12 = scmp.lt.s32.totalorder %s1149_s13, %s1415_s4 }
  0x36   : > { %v518_v10 = vld [vmem:[#allocation5 + $0x700] sm:$0xff]  ;;  %v243_v14 = vld.sshfl [vmem:[#allocation1] sm:$0xff pattern:$0x75316420]  ;;  %553 = vmatpush.msra.mxu2 %v390_v9  ;;  %v528_v9 = vld [vmem:[#allocation5 + $0x750] sm:$0xff]  ;;  %p1156_p8 = scmp.lt.s32.totalorder %s1154_s23, %s1150_s14 }
  0x37   : > { %v244_v15 = vld.sshfl [vmem:[#allocation1 + $0x8] sm:$0xff pattern:$0x75316420]  ;;  %573 = vmatpush.msra.mxu3 %v518_v10  ;;  %1002 = vmatpush.msk.msra.mxu0 %vm249_vm0, %v243_v14  ;;  %v382_v16 = vld [vmem:[#allocation5 + $0x2c0] sm:$0xff]  ;;  %v391_v26 = vld [vmem:[#allocation5 + $0x308] sm:$0xff]  ;;  %p1152_p3 = pnand %p1151_p1, %p1295_p13 }
  0x38   : > { %1004 = vmatpush.msk.msra.mxu1 %vm249_vm0, %v244_v15  ;;  %v510_v17 = vld [vmem:[#allocation5 + $0x6c0] sm:$0xff]  ;;  %1003 = vmatmul.msk.f32.vlgmr.msra.gmra.mxu0 %vm245_vm1, %v234_v11  ;;  %v519_v27 = vld [vmem:[#allocation5 + $0x708] sm:$0xff]  ;;  %v392_v14 = vld [vmem:[#allocation5 + $0x310] sm:$0xff]  ;;  %p1157_p7 = por %p1156_p8, %p1155_p12 }
  0x39   : > { %1005 = vmatmul.msk.f32.vlgmr.msra.gmra.mxu1 %vm245_vm1, %v234_v11  ;;  %590 = vmatpush.msrb.mxu0 %v415_v12  ;;  %v374_v20 = vld [vmem:[#allocation5 + $0x280] sm:$0xff]  ;;  %v383_v30 = vld [vmem:[#allocation5 + $0x2c8] sm:$0xff]  ;;  %v417_v12 = vld [vmem:[#allocation5 + $0x3d8] sm:$0xff]  ;;  %p1153_p5 = pneg %p1152_p3 }
  0x3a   : > { %610 = vmatpush.msrb.mxu1 %v543_v13  ;;  %v502_v21 = vld [vmem:[#allocation5 + $0x680] sm:$0xff]  ;;  %554 = vmatpush.msra.mxu2 %v382_v16  ;;  %v511_v31 = vld [vmem:[#allocation5 + $0x6c8] sm:$0xff]  ;;  %v545_v13 = vld [vmem:[#allocation5 + $0x7d8] sm:$0xff] }
  0x3b   : > { %574 = vmatpush.msra.mxu3 %v510_v17  ;;  %591 = vmatpush.msrb.mxu0 %v407_v18  ;;  %v366_v24 = vld [vmem:[#allocation5 + $0x240] sm:$0xff]  ;;  %v375_v34 = vld [vmem:[#allocation5 + $0x288] sm:$0xff]  ;;  %v520_v15 = vld [vmem:[#allocation5 + $0x710] sm:$0xff]  ;;  %p1158_p9 = pnand %p1157_p7, %p1153_p5 }
  0x3c   : > { %611 = vmatpush.msrb.mxu1 %v535_v19  ;;  %v494_v25 = vld [vmem:[#allocation5 + $0x640] sm:$0xff]  ;;  %555 = vmatpush.msra.mxu2 %v374_v20  ;;  %v503_v35 = vld [vmem:[#allocation5 + $0x688] sm:$0xff]  ;;  %v409_v16 = vld [vmem:[#allocation5 + $0x398] sm:$0xff] }
  0x3d   : > { %575 = vmatpush.msra.mxu3 %v502_v21  ;;  %592 = vmatpush.msrb.mxu0 %v399_v22  ;;  %v358_v28 = vld [vmem:[#allocation5 + $0x200] sm:$0xff]  ;;  %v367_v38 = vld [vmem:[#allocation5 + $0x248] sm:$0xff]  ;;  %v537_v17 = vld [vmem:[#allocation5 + $0x798] sm:$0xff] }
  0x3e   : > { %612 = vmatpush.msrb.mxu1 %v527_v23  ;;  %v486_v29 = vld [vmem:[#allocation5 + $0x600] sm:$0xff]  ;;  %556 = vmatpush.msra.mxu2 %v366_v24  ;;  %v495_v39 = vld [vmem:[#allocation5 + $0x648] sm:$0xff]  ;;  %v384_v18 = vld [vmem:[#allocation5 + $0x2d0] sm:$0xff] }
  0x3f   : > { %576 = vmatpush.msra.mxu3 %v494_v25  ;;  %593 = vmatpush.msrb.mxu0 %v391_v26  ;;  %v350_v32 = vld [vmem:[#allocation5 + $0x1c0] sm:$0xff]  ;;  %v359_v42 = vld [vmem:[#allocation5 + $0x208] sm:$0xff]  ;;  %v512_v19 = vld [vmem:[#allocation5 + $0x6d0] sm:$0xff] }
  0x40   : > { %613 = vmatpush.msrb.mxu1 %v519_v27  ;;  %v478_v33 = vld [vmem:[#allocation5 + $0x5c0] sm:$0xff]  ;;  %557 = vmatpush.msra.mxu2 %v358_v28  ;;  %v487_v43 = vld [vmem:[#allocation5 + $0x608] sm:$0xff]  ;;  %v401_v20 = vld [vmem:[#allocation5 + $0x358] sm:$0xff] }
  0x41   : > { %577 = vmatpush.msra.mxu3 %v486_v29  ;;  %594 = vmatpush.msrb.mxu0 %v383_v30  ;;  %v342_v36 = vld [vmem:[#allocation5 + $0x180] sm:$0xff]  ;;  %v351_v46 = vld [vmem:[#allocation5 + $0x1c8] sm:$0xff]  ;;  %v529_v21 = vld [vmem:[#allocation5 + $0x758] sm:$0xff] }
  0x42   : > { %614 = vmatpush.msrb.mxu1 %v511_v31  ;;  %v470_v37 = vld [vmem:[#allocation5 + $0x580] sm:$0xff]  ;;  %558 = vmatpush.msra.mxu2 %v350_v32  ;;  %v479_v47 = vld [vmem:[#allocation5 + $0x5c8] sm:$0xff]  ;;  %v376_v22 = vld [vmem:[#allocation5 + $0x290] sm:$0xff] }
  0x43   : > { %578 = vmatpush.msra.mxu3 %v478_v33  ;;  %595 = vmatpush.msrb.mxu0 %v375_v34  ;;  %v334_v40 = vld [vmem:[#allocation5 + $0x140] sm:$0xff]  ;;  %v343_v50 = vld [vmem:[#allocation5 + $0x188] sm:$0xff]  ;;  %v504_v23 = vld [vmem:[#allocation5 + $0x690] sm:$0xff] }
  0x44   : > { %615 = vmatpush.msrb.mxu1 %v503_v35  ;;  %v462_v41 = vld [vmem:[#allocation5 + $0x540] sm:$0xff]  ;;  %559 = vmatpush.msra.mxu2 %v342_v36  ;;  %v471_v51 = vld [vmem:[#allocation5 + $0x588] sm:$0xff]  ;;  %v393_v24 = vld [vmem:[#allocation5 + $0x318] sm:$0xff] }
  0x45   : > { %579 = vmatpush.msra.mxu3 %v470_v37  ;;  %596 = vmatpush.msrb.mxu0 %v367_v38  ;;  %v326_v44 = vld [vmem:[#allocation5 + $0x100] sm:$0xff]  ;;  %v335_v54 = vld [vmem:[#allocation5 + $0x148] sm:$0xff]  ;;  %v521_v25 = vld [vmem:[#allocation5 + $0x718] sm:$0xff] }
  0x46   : > { %616 = vmatpush.msrb.mxu1 %v495_v39  ;;  %v454_v45 = vld [vmem:[#allocation5 + $0x500] sm:$0xff]  ;;  %560 = vmatpush.msra.mxu2 %v334_v40  ;;  %v463_v55 = vld [vmem:[#allocation5 + $0x548] sm:$0xff]  ;;  %v368_v26 = vld [vmem:[#allocation5 + $0x250] sm:$0xff] }
  0x47   : > { %580 = vmatpush.msra.mxu3 %v462_v41  ;;  %597 = vmatpush.msrb.mxu0 %v359_v42  ;;  %v318_v48 = vld [vmem:[#allocation5 + $0xc0] sm:$0xff]  ;;  %v327_v58 = vld [vmem:[#allocation5 + $0x108] sm:$0xff]  ;;  %v496_v27 = vld [vmem:[#allocation5 + $0x650] sm:$0xff] }
  0x48   : > { %617 = vmatpush.msrb.mxu1 %v487_v43  ;;  %v446_v49 = vld [vmem:[#allocation5 + $0x4c0] sm:$0xff]  ;;  %561 = vmatpush.msra.mxu2 %v326_v44  ;;  %v455_v59 = vld [vmem:[#allocation5 + $0x508] sm:$0xff]  ;;  %v385_v28 = vld [vmem:[#allocation5 + $0x2d8] sm:$0xff] }
  0x49   : > { %581 = vmatpush.msra.mxu3 %v454_v45  ;;  %598 = vmatpush.msrb.mxu0 %v351_v46  ;;  %v310_v52 = vld [vmem:[#allocation5 + $0x80] sm:$0xff]  ;;  %v319_v62 = vld [vmem:[#allocation5 + $0xc8] sm:$0xff]  ;;  %v513_v29 = vld [vmem:[#allocation5 + $0x6d8] sm:$0xff] }
  0x4a   : > { %618 = vmatpush.msrb.mxu1 %v479_v47  ;;  %v438_v53 = vld [vmem:[#allocation5 + $0x480] sm:$0xff]  ;;  %562 = vmatpush.msra.mxu2 %v318_v48  ;;  %v447_v63 = vld [vmem:[#allocation5 + $0x4c8] sm:$0xff]  ;;  %v360_v30 = vld [vmem:[#allocation5 + $0x210] sm:$0xff] }
  0x4b   : > { %582 = vmatpush.msra.mxu3 %v446_v49  ;;  %599 = vmatpush.msrb.mxu0 %v343_v50  ;;  %v302_v56 = vld [vmem:[#allocation5 + $0x40] sm:$0xff]  ;;  %v311_v2 = vld [vmem:[#allocation5 + $0x88] sm:$0xff]  ;;  %v488_v31 = vld [vmem:[#allocation5 + $0x610] sm:$0xff] }
  0x4c   : > { %619 = vmatpush.msrb.mxu1 %v471_v51  ;;  %v430_v57 = vld [vmem:[#allocation5 + $0x440] sm:$0xff]  ;;  %563 = vmatpush.msra.mxu2 %v310_v52  ;;  %v439_v3 = vld [vmem:[#allocation5 + $0x488] sm:$0xff]  ;;  %v377_v32 = vld [vmem:[#allocation5 + $0x298] sm:$0xff] }
  0x4d   : > { %583 = vmatpush.msra.mxu3 %v438_v53  ;;  %600 = vmatpush.msrb.mxu0 %v335_v54  ;;  %v294_v60 = vld [vmem:[#allocation5] sm:$0xff]  ;;  %v303_v6 = vld [vmem:[#allocation5 + $0x48] sm:$0xff]  ;;  %v505_v33 = vld [vmem:[#allocation5 + $0x698] sm:$0xff] }
  0x4e   : > { %620 = vmatpush.msrb.mxu1 %v463_v55  ;;  %v422_v61 = vld [vmem:[#allocation5 + $0x400] sm:$0xff]  ;;  %564 = vmatpush.msra.mxu2 %v302_v56  ;;  %v431_v7 = vld [vmem:[#allocation5 + $0x448] sm:$0xff]  ;;  %v352_v34 = vld [vmem:[#allocation5 + $0x1d0] sm:$0xff] }
  0x4f   : > { %584 = vmatpush.msra.mxu3 %v430_v57  ;;  %601 = vmatpush.msrb.mxu0 %v327_v58  ;;  %v295_v10 = vld [vmem:[#allocation5 + $0x8] sm:$0xff]  ;;  %v480_v35 = vld [vmem:[#allocation5 + $0x5d0] sm:$0xff]  ;;  %v369_v36 = vld [vmem:[#allocation5 + $0x258] sm:$0xff] }
  0x50   : > { %621 = vmatpush.msrb.mxu1 %v455_v59  ;;  %565 = vmatpush.msra.mxu2 %v294_v60  ;;  %v423_v11 = vld [vmem:[#allocation5 + $0x408] sm:$0xff]  ;;  %v497_v37 = vld [vmem:[#allocation5 + $0x658] sm:$0xff]  ;;  %v344_v38 = vld [vmem:[#allocation5 + $0x190] sm:$0xff] }
  0x51   : > { %585 = vmatpush.msra.mxu3 %v422_v61  ;;  %602 = vmatpush.msrb.mxu0 %v319_v62  ;;  %v472_v39 = vld [vmem:[#allocation5 + $0x590] sm:$0xff]  ;;  %v361_v40 = vld [vmem:[#allocation5 + $0x218] sm:$0xff] }
  0x52   : > { %622 = vmatpush.msrb.mxu1 %v447_v63  ;;  %630 = vmatpush.msrb.mxu2 %v416_v0  ;;  %v489_v41 = vld [vmem:[#allocation5 + $0x618] sm:$0xff]  ;;  %v336_v42 = vld [vmem:[#allocation5 + $0x150] sm:$0xff] }
  0x53   : > { %650 = vmatpush.msrb.mxu3 %v544_v1  ;;  %603 = vmatpush.msrb.mxu0 %v311_v2  ;;  %v464_v43 = vld [vmem:[#allocation5 + $0x550] sm:$0xff]  ;;  %v353_v44 = vld [vmem:[#allocation5 + $0x1d8] sm:$0xff] }
  0x54   : > { %623 = vmatpush.msrb.mxu1 %v439_v3  ;;  %631 = vmatpush.msrb.mxu2 %v408_v4  ;;  %v481_v45 = vld [vmem:[#allocation5 + $0x5d8] sm:$0xff]  ;;  %v328_v46 = vld [vmem:[#allocation5 + $0x110] sm:$0xff] }
  0x55   : > { %651 = vmatpush.msrb.mxu3 %v536_v5  ;;  %604 = vmatpush.msrb.mxu0 %v303_v6  ;;  %v456_v47 = vld [vmem:[#allocation5 + $0x510] sm:$0xff]  ;;  %v345_v48 = vld [vmem:[#allocation5 + $0x198] sm:$0xff] }
  0x56   : > { %624 = vmatpush.msrb.mxu1 %v431_v7  ;;  %632 = vmatpush.msrb.mxu2 %v400_v8  ;;  %v473_v49 = vld [vmem:[#allocation5 + $0x598] sm:$0xff]  ;;  %v320_v50 = vld [vmem:[#allocation5 + $0xd0] sm:$0xff] }
  0x57   : > { %652 = vmatpush.msrb.mxu3 %v528_v9  ;;  %605 = vmatpush.msrb.mxu0 %v295_v10  ;;  %v448_v51 = vld [vmem:[#allocation5 + $0x4d0] sm:$0xff]  ;;  %v337_v52 = vld [vmem:[#allocation5 + $0x158] sm:$0xff] }
  0x58   : > { %625 = vmatpush.msrb.mxu1 %v423_v11  ;;  %633 = vmatpush.msrb.mxu2 %v392_v14  ;;  %v465_v53 = vld [vmem:[#allocation5 + $0x558] sm:$0xff]  ;;  %v312_v54 = vld [vmem:[#allocation5 + $0x90] sm:$0xff]  ;;  %v418_v11 = vld [vmem:[#allocation5 + $0x3e0] sm:$0xff] }
  0x59   : > { %670 = vmatpush.msra.mxu0 %v417_v12  ;;  %653 = vmatpush.msrb.mxu3 %v520_v15  ;;  %v440_v55 = vld [vmem:[#allocation5 + $0x490] sm:$0xff]  ;;  %v329_v56 = vld [vmem:[#allocation5 + $0x118] sm:$0xff]  ;;  %v546_v12 = vld [vmem:[#allocation5 + $0x7e0] sm:$0xff] }
  0x5a   : > { %690 = vmatpush.msra.mxu1 %v545_v13  ;;  %634 = vmatpush.msrb.mxu2 %v384_v18  ;;  %v457_v57 = vld [vmem:[#allocation5 + $0x518] sm:$0xff]  ;;  %v304_v58 = vld [vmem:[#allocation5 + $0x50] sm:$0xff]  ;;  %v419_v13 = vld [vmem:[#allocation5 + $0x3e8] sm:$0xff] }
  0x5b   : > { %671 = vmatpush.msra.mxu0 %v409_v16  ;;  %654 = vmatpush.msrb.mxu3 %v512_v19  ;;  %v432_v59 = vld [vmem:[#allocation5 + $0x450] sm:$0xff]  ;;  %v321_v60 = vld [vmem:[#allocation5 + $0xd8] sm:$0xff]  ;;  %v547_v14 = vld [vmem:[#allocation5 + $0x7e8] sm:$0xff] }
  0x5c   : > { %691 = vmatpush.msra.mxu1 %v537_v17  ;;  %635 = vmatpush.msrb.mxu2 %v376_v22  ;;  %v449_v61 = vld [vmem:[#allocation5 + $0x4d8] sm:$0xff]  ;;  %v296_v2 = vld [vmem:[#allocation5 + $0x10] sm:$0xff]  ;;  %v410_v15 = vld [vmem:[#allocation5 + $0x3a0] sm:$0xff] }
  0x5d   : > { %672 = vmatpush.msra.mxu0 %v401_v20  ;;  %655 = vmatpush.msrb.mxu3 %v504_v23  ;;  %v313_v62 = vld [vmem:[#allocation5 + $0x98] sm:$0xff]  ;;  %v424_v3 = vld [vmem:[#allocation5 + $0x410] sm:$0xff]  ;;  %v538_v16 = vld [vmem:[#allocation5 + $0x7a0] sm:$0xff] }
  0x5e   : > { %692 = vmatpush.msra.mxu1 %v529_v21  ;;  %636 = vmatpush.msrb.mxu2 %v368_v26  ;;  %v441_v63 = vld [vmem:[#allocation5 + $0x498] sm:$0xff]  ;;  %v411_v17 = vld [vmem:[#allocation5 + $0x3a8] sm:$0xff]  ;;  %v402_v19 = vld [vmem:[#allocation5 + $0x360] sm:$0xff] }
  0x5f   : > { %673 = vmatpush.msra.mxu0 %v393_v24  ;;  %656 = vmatpush.msrb.mxu3 %v496_v27  ;;  %v305_v0 = vld [vmem:[#allocation5 + $0x58] sm:$0xff]  ;;  %v539_v18 = vld [vmem:[#allocation5 + $0x7a8] sm:$0xff]  ;;  %v530_v20 = vld [vmem:[#allocation5 + $0x760] sm:$0xff] }
  0x60   : > { %693 = vmatpush.msra.mxu1 %v521_v25  ;;  %637 = vmatpush.msrb.mxu2 %v360_v30  ;;  %v433_v1 = vld [vmem:[#allocation5 + $0x458] sm:$0xff]  ;;  %v403_v21 = vld [vmem:[#allocation5 + $0x368] sm:$0xff]  ;;  %v394_v23 = vld [vmem:[#allocation5 + $0x320] sm:$0xff] }
  0x61   : > { %674 = vmatpush.msra.mxu0 %v385_v28  ;;  %657 = vmatpush.msrb.mxu3 %v488_v31  ;;  %v297_v4 = vld [vmem:[#allocation5 + $0x18] sm:$0xff]  ;;  %v531_v22 = vld [vmem:[#allocation5 + $0x768] sm:$0xff]  ;;  %v522_v24 = vld [vmem:[#allocation5 + $0x720] sm:$0xff] }
  0x62   : > { %694 = vmatpush.msra.mxu1 %v513_v29  ;;  %638 = vmatpush.msrb.mxu2 %v352_v34  ;;  %v425_v5 = vld [vmem:[#allocation5 + $0x418] sm:$0xff]  ;;  %v395_v25 = vld [vmem:[#allocation5 + $0x328] sm:$0xff]  ;;  %v386_v27 = vld [vmem:[#allocation5 + $0x2e0] sm:$0xff] }
  0x63   : > { %675 = vmatpush.msra.mxu0 %v377_v32  ;;  %658 = vmatpush.msrb.mxu3 %v480_v35  ;;  %v523_v26 = vld [vmem:[#allocation5 + $0x728] sm:$0xff]  ;;  %v514_v28 = vld [vmem:[#allocation5 + $0x6e0] sm:$0xff] }
  0x64   : > { %695 = vmatpush.msra.mxu1 %v505_v33  ;;  %639 = vmatpush.msrb.mxu2 %v344_v38  ;;  %v387_v29 = vld [vmem:[#allocation5 + $0x2e8] sm:$0xff]  ;;  %v378_v31 = vld [vmem:[#allocation5 + $0x2a0] sm:$0xff] }
  0x65   : > { %676 = vmatpush.msra.mxu0 %v369_v36  ;;  %659 = vmatpush.msrb.mxu3 %v472_v39  ;;  %v515_v30 = vld [vmem:[#allocation5 + $0x6e8] sm:$0xff]  ;;  %v506_v32 = vld [vmem:[#allocation5 + $0x6a0] sm:$0xff] }
  0x66   : > { %696 = vmatpush.msra.mxu1 %v497_v37  ;;  %640 = vmatpush.msrb.mxu2 %v336_v42  ;;  %v379_v33 = vld [vmem:[#allocation5 + $0x2a8] sm:$0xff]  ;;  %v370_v35 = vld [vmem:[#allocation5 + $0x260] sm:$0xff] }
  0x67   : > { %677 = vmatpush.msra.mxu0 %v361_v40  ;;  %660 = vmatpush.msrb.mxu3 %v464_v43  ;;  %v507_v34 = vld [vmem:[#allocation5 + $0x6a8] sm:$0xff]  ;;  %v498_v36 = vld [vmem:[#allocation5 + $0x660] sm:$0xff] }
  0x68   : > { %697 = vmatpush.msra.mxu1 %v489_v41  ;;  %641 = vmatpush.msrb.mxu2 %v328_v46  ;;  %v371_v37 = vld [vmem:[#allocation5 + $0x268] sm:$0xff]  ;;  %v362_v39 = vld [vmem:[#allocation5 + $0x220] sm:$0xff] }
  0x69   : > { %678 = vmatpush.msra.mxu0 %v353_v44  ;;  %661 = vmatpush.msrb.mxu3 %v456_v47  ;;  %v499_v38 = vld [vmem:[#allocation5 + $0x668] sm:$0xff]  ;;  %v490_v40 = vld [vmem:[#allocation5 + $0x620] sm:$0xff] }
  0x6a   : > { %698 = vmatpush.msra.mxu1 %v481_v45  ;;  %642 = vmatpush.msrb.mxu2 %v320_v50  ;;  %v363_v41 = vld [vmem:[#allocation5 + $0x228] sm:$0xff]  ;;  %v354_v43 = vld [vmem:[#allocation5 + $0x1e0] sm:$0xff] }
  0x6b   : > { %679 = vmatpush.msra.mxu0 %v345_v48  ;;  %662 = vmatpush.msrb.mxu3 %v448_v51  ;;  %v491_v42 = vld [vmem:[#allocation5 + $0x628] sm:$0xff]  ;;  %v482_v44 = vld [vmem:[#allocation5 + $0x5e0] sm:$0xff] }
  0x6c   : > { %699 = vmatpush.msra.mxu1 %v473_v49  ;;  %643 = vmatpush.msrb.mxu2 %v312_v54  ;;  %v355_v45 = vld [vmem:[#allocation5 + $0x1e8] sm:$0xff]  ;;  %v346_v47 = vld [vmem:[#allocation5 + $0x1a0] sm:$0xff] }
  0x6d   : > { %680 = vmatpush.msra.mxu0 %v337_v52  ;;  %663 = vmatpush.msrb.mxu3 %v440_v55  ;;  %v483_v46 = vld [vmem:[#allocation5 + $0x5e8] sm:$0xff]  ;;  %v474_v48 = vld [vmem:[#allocation5 + $0x5a0] sm:$0xff] }
  0x6e   : > { %700 = vmatpush.msra.mxu1 %v465_v53  ;;  %644 = vmatpush.msrb.mxu2 %v304_v58  ;;  %v347_v49 = vld [vmem:[#allocation5 + $0x1a8] sm:$0xff]  ;;  %v338_v51 = vld [vmem:[#allocation5 + $0x160] sm:$0xff] }
  0x6f   : > { %681 = vmatpush.msra.mxu0 %v329_v56  ;;  %664 = vmatpush.msrb.mxu3 %v432_v59  ;;  %v475_v50 = vld [vmem:[#allocation5 + $0x5a8] sm:$0xff]  ;;  %v466_v52 = vld [vmem:[#allocation5 + $0x560] sm:$0xff] }
  0x70   : > { %701 = vmatpush.msra.mxu1 %v457_v57  ;;  %645 = vmatpush.msrb.mxu2 %v296_v2  ;;  %v339_v53 = vld [vmem:[#allocation5 + $0x168] sm:$0xff]  ;;  %v330_v55 = vld [vmem:[#allocation5 + $0x120] sm:$0xff] }
  0x71   : > { %682 = vmatpush.msra.mxu0 %v321_v60  ;;  %665 = vmatpush.msrb.mxu3 %v424_v3  ;;  %v467_v54 = vld [vmem:[#allocation5 + $0x568] sm:$0xff]  ;;  %v458_v56 = vld [vmem:[#allocation5 + $0x520] sm:$0xff] }
  0x72   : > { %702 = vmatpush.msra.mxu1 %v449_v61  ;;  %v331_v57 = vld [vmem:[#allocation5 + $0x128] sm:$0xff]  ;;  %v322_v59 = vld [vmem:[#allocation5 + $0xe0] sm:$0xff] }
  0x73   : > { %683 = vmatpush.msra.mxu0 %v313_v62  ;;  %v459_v58 = vld [vmem:[#allocation5 + $0x528] sm:$0xff]  ;;  %v450_v60 = vld [vmem:[#allocation5 + $0x4e0] sm:$0xff] }
  0x74   : > { %703 = vmatpush.msra.mxu1 %v441_v63  ;;  %v323_v61 = vld [vmem:[#allocation5 + $0xe8] sm:$0xff]  ;;  %v314_v63 = vld [vmem:[#allocation5 + $0xa0] sm:$0xff] }
  0x75   : > { %684 = vmatpush.msra.mxu0 %v305_v0  ;;  %v451_v62 = vld [vmem:[#allocation5 + $0x4e8] sm:$0xff]  ;;  %v442_v0 = vld [vmem:[#allocation5 + $0x4a0] sm:$0xff] }
  0x76   : > { %704 = vmatpush.msra.mxu1 %v433_v1  ;;  %v315_v1 = vld [vmem:[#allocation5 + $0xa8] sm:$0xff]  ;;  %v306_v3 = vld [vmem:[#allocation5 + $0x60] sm:$0xff] }
  0x77   : > { %685 = vmatpush.msra.mxu0 %v297_v4  ;;  %v443_v2 = vld [vmem:[#allocation5 + $0x4a8] sm:$0xff]  ;;  %v434_v4 = vld [vmem:[#allocation5 + $0x460] sm:$0xff] }
  0x78   : > { %705 = vmatpush.msra.mxu1 %v425_v5  ;;  %v307_v5 = vld [vmem:[#allocation5 + $0x68] sm:$0xff] }
  0xa2   : > { %v239_v6 = vpop.permute.xlu0 %238 }
  0xb5   : > { %v271_v7 = vpop.f32.mrf.mxu0 }
  0xb6   : > { %v291_v8 = vpop.f32.mrf.mxu1  ;;  %v1346_v9 = vadd.f32 %v271_v7, %v239_v6  ;;  %v298_v7 = vld [vmem:[#allocation5 + $0x20] sm:$0xff] }
  0xb7   : > { %v1348_v10 = vadd.f32 %v291_v8, %v239_v6  ;;  %v435_v6 = vld [vmem:[#allocation5 + $0x468] sm:$0xff]  ;;  %v426_v8 = vld [vmem:[#allocation5 + $0x420] sm:$0xff] }
  0xb8   : > { %566 = vmatmul.f32.vlgmr.msra.gmra.mxu2 %v1346_v9  ;;  %606 = vmatmul.f32.vlgmr.msrb.gmra.mxu0 %v1346_v9 }
  0xb9   : > { %586 = vmatmul.f32.vlgmr.msra.gmra.mxu3 %v1348_v10  ;;  %626 = vmatmul.f32.vlgmr.msrb.gmra.mxu1 %v1348_v10 }
  0xba   : > { %710 = vmatpush.msra.mxu2 %v418_v11  ;;  %730 = vmatpush.msra.mxu3 %v546_v12  ;;  %v299_v11 = vld [vmem:[#allocation5 + $0x28] sm:$0xff] }
  0xbb   : > { %750 = vmatpush.msrb.mxu0 %v419_v13  ;;  %770 = vmatpush.msrb.mxu1 %v547_v14  ;;  %v427_v12 = vld [vmem:[#allocation5 + $0x428] sm:$0xff]  ;;  %v420_v13 = vld [vmem:[#allocation5 + $0x3f0] sm:$0xff] }
  0xbc   : > { %711 = vmatpush.msra.mxu2 %v410_v15  ;;  %731 = vmatpush.msra.mxu3 %v538_v16  ;;  %v548_v14 = vld [vmem:[#allocation5 + $0x7f0] sm:$0xff]  ;;  %v421_v15 = vld [vmem:[#allocation5 + $0x3f8] sm:$0xff] }
  0xbd   : > { %751 = vmatpush.msrb.mxu0 %v411_v17  ;;  %771 = vmatpush.msrb.mxu1 %v539_v18  ;;  %v549_v16 = vld [vmem:[#allocation5 + $0x7f8] sm:$0xff]  ;;  %v412_v17 = vld [vmem:[#allocation5 + $0x3b0] sm:$0xff] }
  0xbe   : > { %712 = vmatpush.msra.mxu2 %v402_v19  ;;  %732 = vmatpush.msra.mxu3 %v530_v20  ;;  %v540_v18 = vld [vmem:[#allocation5 + $0x7b0] sm:$0xff]  ;;  %v413_v19 = vld [vmem:[#allocation5 + $0x3b8] sm:$0xff] }
  0xbf   : > { %752 = vmatpush.msrb.mxu0 %v403_v21  ;;  %772 = vmatpush.msrb.mxu1 %v531_v22  ;;  %v541_v20 = vld [vmem:[#allocation5 + $0x7b8] sm:$0xff]  ;;  %v404_v21 = vld [vmem:[#allocation5 + $0x370] sm:$0xff] }
  0xc0   : > { %713 = vmatpush.msra.mxu2 %v394_v23  ;;  %733 = vmatpush.msra.mxu3 %v522_v24  ;;  %v532_v22 = vld [vmem:[#allocation5 + $0x770] sm:$0xff]  ;;  %v405_v23 = vld [vmem:[#allocation5 + $0x378] sm:$0xff] }
  0xc1   : > { %753 = vmatpush.msrb.mxu0 %v395_v25  ;;  %773 = vmatpush.msrb.mxu1 %v523_v26  ;;  %v533_v24 = vld [vmem:[#allocation5 + $0x778] sm:$0xff]  ;;  %v396_v25 = vld [vmem:[#allocation5 + $0x330] sm:$0xff] }
  0xc2   : > { %646 = vmatmul.f32.vlgmr.msrb.gmra.mxu2 %v1346_v9  ;;  %666 = vmatmul.f32.vlgmr.msrb.gmra.mxu3 %v1348_v10  ;;  %v524_v26 = vld [vmem:[#allocation5 + $0x730] sm:$0xff] }
  0xc3   : > { %686 = vmatmul.f32.vlgmr.msra.gmra.mxu0 %v1346_v9  ;;  %706 = vmatmul.f32.vlgmr.msra.gmra.mxu1 %v1348_v10 }
  0xc4   : > { %714 = vmatpush.msra.mxu2 %v386_v27  ;;  %734 = vmatpush.msra.mxu3 %v514_v28  ;;  %v397_v27 = vld [vmem:[#allocation5 + $0x338] sm:$0xff] }
  0xc5   : > { %754 = vmatpush.msrb.mxu0 %v387_v29  ;;  %774 = vmatpush.msrb.mxu1 %v515_v30  ;;  %v525_v28 = vld [vmem:[#allocation5 + $0x738] sm:$0xff]  ;;  %v388_v29 = vld [vmem:[#allocation5 + $0x2f0] sm:$0xff] }
  0xc6   : > { %715 = vmatpush.msra.mxu2 %v378_v31  ;;  %735 = vmatpush.msra.mxu3 %v506_v32  ;;  %v516_v30 = vld [vmem:[#allocation5 + $0x6f0] sm:$0xff]  ;;  %v389_v31 = vld [vmem:[#allocation5 + $0x2f8] sm:$0xff] }
  0xc7   : > { %755 = vmatpush.msrb.mxu0 %v379_v33  ;;  %775 = vmatpush.msrb.mxu1 %v507_v34  ;;  %v517_v32 = vld [vmem:[#allocation5 + $0x6f8] sm:$0xff]  ;;  %v380_v33 = vld [vmem:[#allocation5 + $0x2b0] sm:$0xff] }
  0xc8   : > { %716 = vmatpush.msra.mxu2 %v370_v35  ;;  %736 = vmatpush.msra.mxu3 %v498_v36  ;;  %v508_v34 = vld [vmem:[#allocation5 + $0x6b0] sm:$0xff]  ;;  %v381_v35 = vld [vmem:[#allocation5 + $0x2b8] sm:$0xff] }
  0xc9   : > { %756 = vmatpush.msrb.mxu0 %v371_v37  ;;  %776 = vmatpush.msrb.mxu1 %v499_v38  ;;  %v509_v36 = vld [vmem:[#allocation5 + $0x6b8] sm:$0xff]  ;;  %v372_v37 = vld [vmem:[#allocation5 + $0x270] sm:$0xff] }
  0xca   : > { %717 = vmatpush.msra.mxu2 %v362_v39  ;;  %737 = vmatpush.msra.mxu3 %v490_v40  ;;  %v500_v38 = vld [vmem:[#allocation5 + $0x670] sm:$0xff]  ;;  %v373_v39 = vld [vmem:[#allocation5 + $0x278] sm:$0xff] }
  0xcb   : > { %757 = vmatpush.msrb.mxu0 %v363_v41  ;;  %777 = vmatpush.msrb.mxu1 %v491_v42  ;;  %v501_v40 = vld [vmem:[#allocation5 + $0x678] sm:$0xff]  ;;  %v364_v41 = vld [vmem:[#allocation5 + $0x230] sm:$0xff] }
  0xcc   : > { %718 = vmatpush.msra.mxu2 %v354_v43  ;;  %738 = vmatpush.msra.mxu3 %v482_v44  ;;  %v492_v42 = vld [vmem:[#allocation5 + $0x630] sm:$0xff]  ;;  %v365_v43 = vld [vmem:[#allocation5 + $0x238] sm:$0xff] }
  0xcd   : > { %758 = vmatpush.msrb.mxu0 %v355_v45  ;;  %778 = vmatpush.msrb.mxu1 %v483_v46  ;;  %v493_v44 = vld [vmem:[#allocation5 + $0x638] sm:$0xff]  ;;  %v356_v45 = vld [vmem:[#allocation5 + $0x1f0] sm:$0xff] }
  0xce   : > { %719 = vmatpush.msra.mxu2 %v346_v47  ;;  %739 = vmatpush.msra.mxu3 %v474_v48  ;;  %v484_v46 = vld [vmem:[#allocation5 + $0x5f0] sm:$0xff]  ;;  %v357_v47 = vld [vmem:[#allocation5 + $0x1f8] sm:$0xff] }
  0xcf   : > { %759 = vmatpush.msrb.mxu0 %v347_v49  ;;  %779 = vmatpush.msrb.mxu1 %v475_v50  ;;  %v485_v48 = vld [vmem:[#allocation5 + $0x5f8] sm:$0xff]  ;;  %v348_v49 = vld [vmem:[#allocation5 + $0x1b0] sm:$0xff] }
  0xd0   : > { %720 = vmatpush.msra.mxu2 %v338_v51  ;;  %740 = vmatpush.msra.mxu3 %v466_v52  ;;  %v476_v50 = vld [vmem:[#allocation5 + $0x5b0] sm:$0xff]  ;;  %v349_v51 = vld [vmem:[#allocation5 + $0x1b8] sm:$0xff] }
  0xd1   : > { %760 = vmatpush.msrb.mxu0 %v339_v53  ;;  %780 = vmatpush.msrb.mxu1 %v467_v54  ;;  %v477_v52 = vld [vmem:[#allocation5 + $0x5b8] sm:$0xff]  ;;  %v340_v53 = vld [vmem:[#allocation5 + $0x170] sm:$0xff] }
  0xd2   : > { %721 = vmatpush.msra.mxu2 %v330_v55  ;;  %741 = vmatpush.msra.mxu3 %v458_v56  ;;  %v468_v54 = vld [vmem:[#allocation5 + $0x570] sm:$0xff]  ;;  %v341_v55 = vld [vmem:[#allocation5 + $0x178] sm:$0xff] }
  0xd3   : > { %761 = vmatpush.msrb.mxu0 %v331_v57  ;;  %781 = vmatpush.msrb.mxu1 %v459_v58  ;;  %v469_v56 = vld [vmem:[#allocation5 + $0x578] sm:$0xff]  ;;  %v332_v57 = vld [vmem:[#allocation5 + $0x130] sm:$0xff] }
  0xd4   : > { %722 = vmatpush.msra.mxu2 %v322_v59  ;;  %742 = vmatpush.msra.mxu3 %v450_v60  ;;  %v460_v58 = vld [vmem:[#allocation5 + $0x530] sm:$0xff]  ;;  %v333_v59 = vld [vmem:[#allocation5 + $0x138] sm:$0xff] }
  0xd5   : > { %762 = vmatpush.msrb.mxu0 %v323_v61  ;;  %782 = vmatpush.msrb.mxu1 %v451_v62  ;;  %v461_v60 = vld [vmem:[#allocation5 + $0x538] sm:$0xff]  ;;  %v324_v61 = vld [vmem:[#allocation5 + $0xf0] sm:$0xff] }
  0xd6   : > { %723 = vmatpush.msra.mxu2 %v314_v63  ;;  %743 = vmatpush.msra.mxu3 %v442_v0  ;;  %v452_v62 = vld [vmem:[#allocation5 + $0x4f0] sm:$0xff]  ;;  %v325_v63 = vld [vmem:[#allocation5 + $0xf8] sm:$0xff] }
  0xd7   : > { %763 = vmatpush.msrb.mxu0 %v315_v1  ;;  %783 = vmatpush.msrb.mxu1 %v443_v2  ;;  %v453_v0 = vld [vmem:[#allocation5 + $0x4f8] sm:$0xff]  ;;  %v316_v1 = vld [vmem:[#allocation5 + $0xb0] sm:$0xff] }
  0xd8   : > { %724 = vmatpush.msra.mxu2 %v306_v3  ;;  %744 = vmatpush.msra.mxu3 %v434_v4  ;;  %v444_v2 = vld [vmem:[#allocation5 + $0x4b0] sm:$0xff]  ;;  %v317_v3 = vld [vmem:[#allocation5 + $0xb8] sm:$0xff] }
  0xd9   : > { %764 = vmatpush.msrb.mxu0 %v307_v5  ;;  %784 = vmatpush.msrb.mxu1 %v435_v6  ;;  %v445_v4 = vld [vmem:[#allocation5 + $0x4b8] sm:$0xff]  ;;  %v308_v5 = vld [vmem:[#allocation5 + $0x70] sm:$0xff] }
  0xda   : > { %725 = vmatpush.msra.mxu2 %v298_v7  ;;  %745 = vmatpush.msra.mxu3 %v426_v8  ;;  %v436_v6 = vld [vmem:[#allocation5 + $0x470] sm:$0xff]  ;;  %v309_v7 = vld [vmem:[#allocation5 + $0x78] sm:$0xff] }
  0xdb   : > { %765 = vmatpush.msrb.mxu0 %v299_v11  ;;  %785 = vmatpush.msrb.mxu1 %v427_v12  ;;  %v437_v8 = vld [vmem:[#allocation5 + $0x478] sm:$0xff]  ;;  %v300_v11 = vld [vmem:[#allocation5 + $0x30] sm:$0xff] }
  0xdc   : > { %726 = vmatmul.f32.vlgmr.msra.gmra.mxu2 %v1346_v9  ;;  %746 = vmatmul.f32.vlgmr.msra.gmra.mxu3 %v1348_v10  ;;  %v428_v12 = vld [vmem:[#allocation5 + $0x430] sm:$0xff] }
  0xdd   : > { %766 = vmatmul.f32.vlgmr.msrb.gmra.mxu0 %v1346_v9  ;;  %786 = vmatmul.f32.vlgmr.msrb.gmra.mxu1 %v1348_v10 }
  0xde   : > { %790 = vmatpush.msrb.mxu2 %v420_v13  ;;  %810 = vmatpush.msrb.mxu3 %v548_v14  ;;  %v301_v13 = vld [vmem:[#allocation5 + $0x38] sm:$0xff] }
  0xdf   : > { %830 = vmatpush.msra.mxu0 %v421_v15  ;;  %850 = vmatpush.msra.mxu1 %v549_v16  ;;  %v429_v14 = vld [vmem:[#allocation5 + $0x438] sm:$0xff] }
  0xe0   : > { %791 = vmatpush.msrb.mxu2 %v412_v17  ;;  %811 = vmatpush.msrb.mxu3 %v540_v18 }
  0xe1   : > { %831 = vmatpush.msra.mxu0 %v413_v19  ;;  %851 = vmatpush.msra.mxu1 %v541_v20 }
  0xe2   : > { %792 = vmatpush.msrb.mxu2 %v404_v21  ;;  %812 = vmatpush.msrb.mxu3 %v532_v22 }
  0xe3   : > { %832 = vmatpush.msra.mxu0 %v405_v23  ;;  %852 = vmatpush.msra.mxu1 %v533_v24 }
  0xe4   : > { %793 = vmatpush.msrb.mxu2 %v396_v25  ;;  %813 = vmatpush.msrb.mxu3 %v524_v26 }
  0xe5   : > { %833 = vmatpush.msra.mxu0 %v397_v27  ;;  %853 = vmatpush.msra.mxu1 %v525_v28 }
  0xe6   : > { %794 = vmatpush.msrb.mxu2 %v388_v29  ;;  %814 = vmatpush.msrb.mxu3 %v516_v30 }
  0xe7   : > { %834 = vmatpush.msra.mxu0 %v389_v31  ;;  %854 = vmatpush.msra.mxu1 %v517_v32 }
  0xe8   : > { %795 = vmatpush.msrb.mxu2 %v380_v33  ;;  %815 = vmatpush.msrb.mxu3 %v508_v34 }
  0xe9   : > { %835 = vmatpush.msra.mxu0 %v381_v35  ;;  %855 = vmatpush.msra.mxu1 %v509_v36 }
  0xea   : > { %796 = vmatpush.msrb.mxu2 %v372_v37  ;;  %816 = vmatpush.msrb.mxu3 %v500_v38 }
  0xeb   : > { %836 = vmatpush.msra.mxu0 %v373_v39  ;;  %856 = vmatpush.msra.mxu1 %v501_v40 }
  0xec   : > { %797 = vmatpush.msrb.mxu2 %v364_v41  ;;  %817 = vmatpush.msrb.mxu3 %v492_v42 }
  0xed   : > { %837 = vmatpush.msra.mxu0 %v365_v43  ;;  %857 = vmatpush.msra.mxu1 %v493_v44 }
  0xee   : > { %798 = vmatpush.msrb.mxu2 %v356_v45  ;;  %818 = vmatpush.msrb.mxu3 %v484_v46 }
  0xef   : > { %838 = vmatpush.msra.mxu0 %v357_v47  ;;  %858 = vmatpush.msra.mxu1 %v485_v48 }
  0xf0   : > { %799 = vmatpush.msrb.mxu2 %v348_v49  ;;  %819 = vmatpush.msrb.mxu3 %v476_v50 }
  0xf1   : > { %839 = vmatpush.msra.mxu0 %v349_v51  ;;  %859 = vmatpush.msra.mxu1 %v477_v52 }
  0xf2   : > { %800 = vmatpush.msrb.mxu2 %v340_v53  ;;  %820 = vmatpush.msrb.mxu3 %v468_v54 }
  0xf3   : > { %840 = vmatpush.msra.mxu0 %v341_v55  ;;  %860 = vmatpush.msra.mxu1 %v469_v56 }
  0xf4   : > { %801 = vmatpush.msrb.mxu2 %v332_v57  ;;  %821 = vmatpush.msrb.mxu3 %v460_v58 }
  0xf5   : > { %841 = vmatpush.msra.mxu0 %v333_v59  ;;  %861 = vmatpush.msra.mxu1 %v461_v60 }
  0xf6   : > { %802 = vmatpush.msrb.mxu2 %v324_v61  ;;  %822 = vmatpush.msrb.mxu3 %v452_v62 }
  0xf7   : > { %842 = vmatpush.msra.mxu0 %v325_v63  ;;  %862 = vmatpush.msra.mxu1 %v453_v0 }
  0xf8   : > { %803 = vmatpush.msrb.mxu2 %v316_v1  ;;  %823 = vmatpush.msrb.mxu3 %v444_v2 }
  0xf9   : > { %843 = vmatpush.msra.mxu0 %v317_v3  ;;  %863 = vmatpush.msra.mxu1 %v445_v4 }
  0xfa   : > { %804 = vmatpush.msrb.mxu2 %v308_v5  ;;  %824 = vmatpush.msrb.mxu3 %v436_v6 }
  0xfb   : > { %844 = vmatpush.msra.mxu0 %v309_v7  ;;  %864 = vmatpush.msra.mxu1 %v437_v8 }
  0xfc   : > { %805 = vmatpush.msrb.mxu2 %v300_v11  ;;  %825 = vmatpush.msrb.mxu3 %v428_v12 }
  0xfd   : > { %845 = vmatpush.msra.mxu0 %v301_v13  ;;  %865 = vmatpush.msra.mxu1 %v429_v14 }
  0xfe   : > { %806 = vmatmul.f32.vlgmr.msrb.gmra.mxu2 %v1346_v9  ;;  %826 = vmatmul.f32.vlgmr.msrb.gmra.mxu3 %v1348_v10 }
  0xff   : > { %846 = vmatmul.f32.vlgmr.msra.gmra.mxu0 %v1346_v9  ;;  %866 = vmatmul.f32.vlgmr.msra.gmra.mxu1 %v1348_v10 }
 0x135   : > { %v607_v15 = vpop.f32.mrf.mxu0 }
 0x136   : > { %v627_v16 = vpop.f32.mrf.mxu1 }
 0x137   : > { %v628_v17 = vadd.f32 %v627_v16, %v607_v15 }
 0x139   : > { %v878_v20 = vrot.slane %v628_v17, 4 }
 0x13b   : > { %v567_v18 = vpop.f32.mrf.mxu2 }
 0x13c   : > { %v587_v19 = vpop.f32.mrf.mxu3 }
 0x13d   : > { %v588_v21 = vadd.f32 %v587_v19, %v567_v18 }
 0x13f   : > { %v882_v22 = vsel %vm249_vm0, %v588_v21, %v878_v20 }
 0x140   : > { %890 = vst [vmem:[%s1368_s26] sm:$0xff] %v882_v22  ;;  %v687_v23 = vpop.f32.mrf.mxu0  ;;  %v707_v24 = vpop.f32.mrf.mxu1 }
 0x141   : > { %v708_v9 = vadd.f32 %v707_v24, %v687_v23 }
 0x143   : > { %v879_v26 = vrot.slane %v708_v9, 4 }
 0x145   : > { %v647_v10 = vpop.f32.mrf.mxu2  ;;  %v667_v25 = vpop.f32.mrf.mxu3 }
 0x146   : > { %v668_v27 = vadd.f32 %v667_v25, %v647_v10 }
 0x148   : > { %v883_v28 = vsel %vm249_vm0, %v668_v27, %v879_v26 }
 0x149   : > { %891 = vst [vmem:[%s1368_s26 + $0x8] sm:$0xff] %v883_v28 }
 0x15a   : > { %v767_v29 = vpop.f32.mrf.mxu0  ;;  %v787_v30 = vpop.f32.mrf.mxu1 }
 0x15b   : > { %v788_v31 = vadd.f32 %v787_v30, %v767_v29 }
 0x15d   : > { %v880_v34 = vrot.slane %v788_v31, 4 }
 0x15f   : > { %v727_v32 = vpop.f32.mrf.mxu2  ;;  %v747_v33 = vpop.f32.mrf.mxu3 }
 0x160   : > { %v748_v35 = vadd.f32 %v747_v33, %v727_v32 }
 0x162   : > { %v884_v36 = vsel %vm249_vm0, %v748_v35, %v880_v34 }
 0x163   : > { %892 = vst [vmem:[%s1368_s26 + $0x10] sm:$0xff] %v884_v36 }
 0x17c   : > { %v847_v37 = vpop.f32.mrf.mxu0  ;;  %v867_v38 = vpop.f32.mrf.mxu1 }
 0x17d   : > { %v868_v39 = vadd.f32 %v867_v38, %v847_v37 }
 0x17f   : > { %v881_v42 = vrot.slane %v868_v39, 4 }
 0x181   : > { %v807_v40 = vpop.f32.mrf.mxu2  ;;  %v827_v41 = vpop.f32.mrf.mxu3 }
 0x182   : > { %v828_v43 = vadd.f32 %v827_v41, %v807_v40 }
 0x184   : > { %v885_v44 = vsel %vm249_vm0, %v828_v43, %v881_v42 }
 0x185   : > { %893 = vst [vmem:[%s1368_s26 + $0x18] sm:$0xff] %v885_v44 }
 0x186   : > { %1161 = shalt.err (!%p1158_p9)
}
 0x187   : > { %1019 = dma.vmem_to_hbm [thread:$0]  (%p1295_p13), %s909_s11, 512, %s911_s12, %s895_s22  }
 0x188 PF: > { %s922_s9 = sand.u32 1, %s1192_s15   ;;  %p1421_p10 = scmp.ge.s32.totalorder %s1204_s18, 2 }
 0x189   : > { %s923_s24 = scalar_lea.sflag [#allocation4], %s922_s9 }
 0x18a   : > { %p1030_p11 = pnand %p1421_p10, %p1300_p4 }
 0x18c   : > { %p1031_p0 = pneg %p1030_p11 }
 0x18e   : > { %1187 = dma.done.wait (%p1031_p0), %s923_s24, 512  }
 0x18f   : > { %1189 = vsyncadd (%p1031_p0), %s923_s24, 4294966784  ;;  %p18_p2 = scmp.ge.s32.totalorder %s1275_s29, 4   ;;  %s1422_s15 = smov %s1196_s16 }
 0x190   : > { %s1423_s16 = smov %s1200_s17  ;;  %s1424_s17 = smov %s1287_s6 }
 0x191   : > { %s1425_s18 = smov %s1275_s29  ;;  %20 = sbr.rel (!%p18_p2) target bundleno = 6 (0x6), region = 85 }
 0x196   :  { %929 = vsyncpa [#allocation3], 1 }
 0x197   :  { %931 = vsyncpa [#allocation3 + $0x1], 1 }
 0x198   :  { %932 = vsyncpa [#allocation6], 1 }
 0x199   :  { %933 = vsyncpa [#allocation4], 1 }
 0x19a   :  { %935 = vsyncpa [#allocation4 + $0x1], 1 }

</bundles_post_ra>
